<compile_context>
chip_gen: v7x
topology: tpu7x:2x2x1
jax: 0.10.0
libtpu: 0.0.40
codegen_flags: <defaults>
</compile_context>

<pallas_src>
import functools
import math

import jax
import jax.numpy as jnp
import numpy as np
from jax.experimental import pallas as pl
from jax.experimental.pallas import tpu as pltpu


# ----------------------------------------------------------------------------
# Static geometry helpers (replicate the PyTorch arithmetic exactly).
# ----------------------------------------------------------------------------
def _level_geometry(h, w, level):
    h_wid = int(math.ceil(h / level))
    w_wid = int(math.ceil(w / level))
    h_pad = (h_wid * level - h + 1) // 2   # == int((...)/2) since value >= 0
    w_pad = (w_wid * level - w + 1) // 2
    # torch.nn.MaxPool2d output size (ceil_mode=False):
    oh = (h + 2 * h_pad - h_wid) // h_wid + 1
    ow = (w + 2 * w_pad - w_wid) // w_wid + 1
    return h_wid, w_wid, h_pad, w_pad, oh, ow


def _level_windows(h, w, level):
    """Clipped [hs,he)x[ws,we) windows of one level, row-major over (oh, ow)."""
    h_wid, w_wid, h_pad, w_pad, oh, ow = _level_geometry(h, w, level)
    wins = []
    for i in range(oh):
        hs = max(i * h_wid - h_pad, 0)
        he = min(i * h_wid - h_pad + h_wid, h)
        for j in range(ow):
            ws = max(j * w_wid - w_pad, 0)
            we = min(j * w_wid - w_pad + w_wid, w)
            wins.append((hs, he, ws, we))
    return wins, oh, ow


def _cover_sources(fine_wins, coarse):
    """Fine cells whose windows tile `coarse` exactly (static check), or None."""
    chs, che, cws, cwe = coarse
    cover = np.zeros((che - chs, cwe - cws), dtype=bool)
    srcs = []
    for idx, (hs, he, ws, we) in enumerate(fine_wins):
        if he <= hs or we <= ws:
            continue
        if hs >= chs and he <= che and ws >= cws and we <= cwe:
            srcs.append(idx)
            cover[hs - chs:he - chs, ws - cws:we - cws] = True
    if srcs and bool(cover.all()):
        return tuple(srcs)
    return None


def _build_plans(h, w, levels):
    """Static compute plans, per level (finest first) and per output row.

    Returns (level_plans, shapes, bases, total_cells).  level_plans is a tuple
    (one entry per level in computation order) of row tuples (hs, he, cells):
    hs/he is the shared window-row range used for pixel cells of that output
    row (None if none).  Each cell is one of
        ("cols",  out_idx, ws, we)          # reduce row-band columns [ws, we)
        ("range", out_idx, s0, s1)          # max over fine out cells [s0, s1)
        ("cells", out_idx, (src_idx, ...))  # max over listed fine out cells
        ("fill",  out_idx)                  # empty (fully padded) window
    out_idx / src_idx are flat positions in the concatenated output slab.
    """
    nl = len(levels)
    windows, shapes = {}, {}
    for k in range(nl):
        wins, oh, ow = _level_windows(h, w, levels[k])
        windows[k] = wins
        shapes[k] = (oh, ow)

    bases, off = {}, 0
    for k in range(nl):
        oh, ow = shapes[k]
        bases[k] = off
        off += oh * ow
    total_cells = off

    order = sorted(range(nl), key=lambda k: -levels[k])   # finest level first
    fine_idx = order[0]
    fine_wins = windows[fine_idx]
    fine_base = bases[fine_idx]

    level_plans = []
    for pos, k in enumerate(order):
        oh, ow = shapes[k]
        rows = []
        for i in range(oh):
            cells, hs_row, he_row = [], None, None
            for j in range(ow):
                ci = i * ow + j
                hs, he, ws, we = windows[k][ci]
                out_idx = bases[k] + ci
                if he <= hs or we <= ws:
                    cells.append(("fill", out_idx))
                    continue
                if pos > 0:
                    srcs = _cover_sources(fine_wins, (hs, he, ws, we))
                    if srcs is not None:
                        srcs = tuple(sorted(fine_base + s for s in srcs))
                        lo, hi = srcs[0], srcs[-1]
                        if srcs == tuple(range(lo, hi + 1)):
                            cells.append(("range", out_idx, lo, hi + 1))
                        else:
                            cells.append(("cells", out_idx, srcs))
                        continue
                hs_row, he_row = hs, he          # shared by all px cells of row
                cells.append(("cols", out_idx, ws, we))
            rows.append((hs_row, he_row, tuple(cells)))
        level_plans.append(tuple(rows))
    return tuple(level_plans), shapes, bases, total_cells


def _pick_lane_block(lanes, max_lblk=512):
    """Lane block: full lanes unless large and 128-divisible (cap register use)."""
    if lanes <= max_lblk or lanes % 128 != 0:
        return lanes
    best = 128
    for m in range(128, max_lblk + 1, 128):
        if lanes % m == 0:
            best = m
    return best


# ----------------------------------------------------------------------------
# Kernel
# ----------------------------------------------------------------------------
def _tree_max(vals):
    """Balanced pairwise jnp.maximum reduction (ILP across VALU slots)."""
    vals = list(vals)
    while len(vals) > 1:
        nxt = [jnp.maximum(a, b) for a, b in zip(vals[0::2], vals[1::2])]
        if len(vals) % 2:
            nxt.append(vals[-1])
        vals = nxt
    return vals[0]


def _spp_kernel(x_ref, out_ref, *, level_plans, w, minval):
    """x_ref: (gblk, H*W, lblk); out_ref: (gblk, total_cells, lblk)."""
    gblk = x_ref.shape[0]
    lblk = x_ref.shape[2]
    for rows in level_plans:
        for hs, he, cells in rows:
            band = None
            if hs is not None:
                # Row band: max over the window's rows using full-width,
                # lane-dense contiguous slab loads (no per-pixel extracts).
                slabs = [x_ref[:, r * w:(r + 1) * w, :] for r in range(hs, he)]
                band = _tree_max(slabs)                    # (gblk, w, lblk)
            for cell in cells:
                kind = cell[0]
                if kind == "cols":
                    _, out_idx, ws, we = cell
                    if we - ws == 1:
                        val = band[:, ws, :]
                    else:
                        val = jnp.max(band[:, ws:we, :], axis=1)
                elif kind == "range":
                    _, out_idx, s0, s1 = cell
                    val = jnp.max(out_ref[:, s0:s1, :], axis=1)
                elif kind == "cells":
                    _, out_idx, srcs = cell
                    val = _tree_max([out_ref[:, s, :] for s in srcs])
                else:  # "fill": window lies entirely inside the padding
                    out_idx = cell[1]
                    val = jnp.full((gblk, lblk), minval, dtype=out_ref.dtype)
                out_ref[:, out_idx, :] = val


# ----------------------------------------------------------------------------
# Wrapper
# ----------------------------------------------------------------------------
def spatial_pyramid_pool(x, levels):
    """JAX/Pallas equivalent of SpatialPyramidPool(levels)(x) for NCHW x."""
    b, c, h, w = x.shape
    dtype = x.dtype
    itemsize = dtype.itemsize
    level_plans, shapes, bases, total_cells = _build_plans(h, w, levels)

    # ---- lane packing: fold batch elements into lanes when C is narrow -----
    g = 1 if c >= 128 else min(b, max(1, 128 // c))
    lanes = g * c
    lblk = _pick_lane_block(lanes)
    ncl = lanes // lblk

    # ---- batch-group blocking against a *padded* tile VMEM budget ----------
    n_groups = -(-b // g)
    sub = 8 * max(1, 4 // itemsize)                 # sublane pack: 8/16/32
    hw_pad = -(-(h * w) // sub) * sub
    cells_pad = -(-total_cells // sub) * sub
    l_pad = -(-lblk // 128) * 128
    in_bytes = hw_pad * l_pad * itemsize
    out_bytes = cells_pad * l_pad * itemsize
    budget = 4 * 1024 * 1024                        # double-buffer safe on v7x 64 MiB
    gblk = max(1, min(n_groups, budget // max(1, in_bytes + out_bytes)))
    if ncl == 1 and n_groups >= 2:                  # keep >=2 parallel steps (v7x 2 TCs)
        gblk = min(gblk, -(-n_groups // 2))
    n_gsteps = -(-n_groups // gblk)
    groups_pad = n_gsteps * gblk
    b_pad = groups_pad * g

    # ---- layout: NCHW -> (groups, H*W, g*C), channels(+batch group) on lanes
    x_cl = jnp.transpose(x, (0, 2, 3, 1)).reshape(b, h * w, c)
    if b_pad != b:
        x_cl = jnp.pad(x_cl, ((0, b_pad - b), (0, 0), (0, 0)))
    x_cl = x_cl.reshape(groups_pad, g, h * w, c)
    x_cl = jnp.transpose(x_cl, (0, 2, 1, 3)).reshape(groups_pad, h * w, lanes)

    if jnp.issubdtype(dtype, jnp.floating):
        minval = float("-inf")
    else:
        minval = int(jnp.iinfo(dtype).min)

    kernel = functools.partial(_spp_kernel, level_plans=level_plans, w=w,
                               minval=minval)

    cost = pl.CostEstimate(
        flops=int(b * c * h * w * len(levels)),
        transcendentals=0,
        bytes_accessed=int((b * c * h * w + b * c * total_cells) * itemsize),
    )

    pooled = pl.pallas_call(
        kernel,
        out_shape=jax.ShapeDtypeStruct((groups_pad, total_cells, lanes), dtype),
        grid=(n_gsteps, ncl),
        in_specs=[pl.BlockSpec((gblk, h * w, lblk), lambda i, j: (i, 0, j))],
        out_specs=pl.BlockSpec((gblk, total_cells, lblk), lambda i, j: (i, 0, j)),
        compiler_params=pltpu.CompilerParams(
            dimension_semantics=("parallel", "parallel")),
        cost_estimate=cost,
    )(x_cl)

    # ---- unpack lanes, restore torch's C-major flatten order, concat -------
    pooled = pooled.reshape(groups_pad, total_cells, g, c)
    pooled = jnp.transpose(pooled, (0, 2, 1, 3)).reshape(b_pad, total_cells, c)
    pooled = pooled[:b]

    flats = []
    for k in range(len(levels)):
        oh, ow = shapes[k]
        sl = pooled[:, bases[k]:bases[k] + oh * ow, :]
        p_nchw = jnp.transpose(sl.reshape(b, oh, ow, c), (0, 3, 1, 2))
        flats.append(p_nchw.reshape(b, -1))
    return jnp.concatenate(flats, axis=1)


# ----------------------------------------------------------------------------
# Pure NumPy reference mirroring the PyTorch semantics.
# ----------------------------------------------------------------------------
def _reference_spp(x_np, levels):
    b, c, h, w = x_np.shape
    outs = []
    for level in levels:
        h_wid, w_wid, h_pad, w_pad, oh, ow = _level_geometry(h, w, level)
        pooled = np.full((b, c, oh, ow), -np.inf, dtype=x_np.dtype)
        for i in range(oh):
            for j in range(ow):
                hs = max(i * h_wid - h_pad, 0)
                he = min(i * h_wid - h_pad + h_wid, h)
                ws = max(j * w_wid - w_pad, 0)
                we = min(j * w_wid - w_pad + w_wid, w)
                if he > hs and we > ws:
                    pooled[:, :, i, j] = x_np[:, :, hs:he, ws:we].max(axis=(2, 3))
        outs.append(pooled.reshape(b, -1))
    return np.concatenate(outs, axis=1)


if __name__ == "__main__":
    key = jax.random.PRNGKey(0)

    # Primary check: same shapes as the original module's usage.
    levels = [4, 2, 1]
    x = jax.random.normal(key, (2, 4, 16, 16), dtype=jnp.float32)  # [b, c, h, w]
    out = jax.block_until_ready(spatial_pyramid_pool(x, levels))
    expected = _reference_spp(np.asarray(x), levels)
    assert out.shape == expected.shape, (out.shape, expected.shape)
    np.testing.assert_allclose(np.asarray(out), expected, rtol=1e-6, atol=1e-6)

    # Secondary check: non-divisible spatial dims exercise padding/clipping,
    # the coarse-from-fine reuse and the row-band fallback at coarse levels.
    levels2 = [3, 2, 1]
    x2 = jax.random.normal(jax.random.PRNGKey(1), (2, 4, 13, 11), dtype=jnp.float32)
    out2 = jax.block_until_ready(spatial_pyramid_pool(x2, levels2))
    expected2 = _reference_spp(np.asarray(x2), levels2)
    assert out2.shape == expected2.shape, (out2.shape, expected2.shape)
    np.testing.assert_allclose(np.asarray(out2), expected2, rtol=1e-6, atol=1e-6)

    print("KERNEL_OK")
</pallas_src>

<mosaic_0001>
module attributes {stable_mosaic.version = 11 : i64} {
  func.func @_spp_kernel(%arg0: i32, %arg1: i32, %arg2: memref<1x256x8xf32, #tpu.memory_space<vmem>>, %arg3: memref<1x21x8xf32, #tpu.memory_space<vmem>>) attributes {dimension_semantics = [#tpu.dimension_semantics<parallel>, #tpu.dimension_semantics<parallel>], iteration_bounds = array<i64: 1, 1>, scalar_prefetch = 0 : i64, scratch_operands = 0 : i64, tpu.core_type = #tpu.core_type<tc>, window_params = [{transform_indices = @transform_0, window_bounds = array<i64: 1, 256, 8>}, {transform_indices = @transform_1, window_bounds = array<i64: 1, 21, 8>}]} {
    %c0 = arith.constant 0 : index
    %c0_0 = arith.constant 0 : index
    %c0_1 = arith.constant 0 : index
    %0 = vector.load %arg2[%c0, %c0_0, %c0_1] : memref<1x256x8xf32, #tpu.memory_space<vmem>>, vector<1x16x8xf32>
    %c0_2 = arith.constant 0 : index
    %c16 = arith.constant 16 : index
    %c0_3 = arith.constant 0 : index
    %1 = vector.load %arg2[%c0_2, %c16, %c0_3] : memref<1x256x8xf32, #tpu.memory_space<vmem>>, vector<1x16x8xf32>
    %c0_4 = arith.constant 0 : index
    %c32 = arith.constant 32 : index
    %c0_5 = arith.constant 0 : index
    %2 = vector.load %arg2[%c0_4, %c32, %c0_5] : memref<1x256x8xf32, #tpu.memory_space<vmem>>, vector<1x16x8xf32>
    %c0_6 = arith.constant 0 : index
    %c48 = arith.constant 48 : index
    %c0_7 = arith.constant 0 : index
    %3 = vector.load %arg2[%c0_6, %c48, %c0_7] : memref<1x256x8xf32, #tpu.memory_space<vmem>>, vector<1x16x8xf32>
    %4 = arith.maximumf %0, %1 : vector<1x16x8xf32>
    %5 = arith.maximumf %2, %3 : vector<1x16x8xf32>
    %6 = arith.maximumf %4, %5 : vector<1x16x8xf32>
    %7 = vector.extract_strided_slice %6 {offsets = [0, 0, 0], sizes = [1, 4, 8], strides = [1, 1, 1]} : vector<1x16x8xf32> to vector<1x4x8xf32>
    %cst = arith.constant dense<0xFF800000> : vector<1x8xf32>
    %8 = vector.multi_reduction <maximumf>, %7, %cst [1] : vector<1x4x8xf32> to vector<1x8xf32>
    %c0_8 = arith.constant 0 : index
    %c0_9 = arith.constant 0 : index
    %c0_10 = arith.constant 0 : index
    %9 = vector.load %arg3[%c0_8, %c0_9, %c0_10] : memref<1x21x8xf32, #tpu.memory_space<vmem>>, vector<1x1x8xf32>
    %10 = vector.shape_cast %9 : vector<1x1x8xf32> to vector<1x8xf32>
    %11 = vector.shape_cast %8 : vector<1x8xf32> to vector<1x1x8xf32>
    tpu.vector_store %arg3[%c0_8, %c0_9, %c0_10], %11 {strides = array<i32>} : memref<1x21x8xf32, #tpu.memory_space<vmem>>, vector<1x1x8xf32>,
    %12 = vector.extract_strided_slice %6 {offsets = [0, 4, 0], sizes = [1, 4, 8], strides = [1, 1, 1]} : vector<1x16x8xf32> to vector<1x4x8xf32>
    %cst_11 = arith.constant dense<0xFF800000> : vector<1x8xf32>
    %13 = vector.multi_reduction <maximumf>, %12, %cst_11 [1] : vector<1x4x8xf32> to vector<1x8xf32>
    %c0_12 = arith.constant 0 : index
    %c1 = arith.constant 1 : index
    %c0_13 = arith.constant 0 : index
    %14 = vector.load %arg3[%c0_12, %c1, %c0_13] : memref<1x21x8xf32, #tpu.memory_space<vmem>>, vector<1x1x8xf32>
    %15 = vector.shape_cast %14 : vector<1x1x8xf32> to vector<1x8xf32>
    %16 = vector.shape_cast %13 : vector<1x8xf32> to vector<1x1x8xf32>
    tpu.vector_store %arg3[%c0_12, %c1, %c0_13], %16 {strides = array<i32>} : memref<1x21x8xf32, #tpu.memory_space<vmem>>, vector<1x1x8xf32>,
    %17 = vector.extract_strided_slice %6 {offsets = [0, 8, 0], sizes = [1, 4, 8], strides = [1, 1, 1]} : vector<1x16x8xf32> to vector<1x4x8xf32>
    %cst_14 = arith.constant dense<0xFF800000> : vector<1x8xf32>
    %18 = vector.multi_reduction <maximumf>, %17, %cst_14 [1] : vector<1x4x8xf32> to vector<1x8xf32>
    %c0_15 = arith.constant 0 : index
    %c2 = arith.constant 2 : index
    %c0_16 = arith.constant 0 : index
    %19 = vector.load %arg3[%c0_15, %c2, %c0_16] : memref<1x21x8xf32, #tpu.memory_space<vmem>>, vector<1x1x8xf32>
    %20 = vector.shape_cast %19 : vector<1x1x8xf32> to vector<1x8xf32>
    %21 = vector.shape_cast %18 : vector<1x8xf32> to vector<1x1x8xf32>
    tpu.vector_store %arg3[%c0_15, %c2, %c0_16], %21 {strides = array<i32>} : memref<1x21x8xf32, #tpu.memory_space<vmem>>, vector<1x1x8xf32>,
    %22 = vector.extract_strided_slice %6 {offsets = [0, 12, 0], sizes = [1, 4, 8], strides = [1, 1, 1]} : vector<1x16x8xf32> to vector<1x4x8xf32>
    %cst_17 = arith.constant dense<0xFF800000> : vector<1x8xf32>
    %23 = vector.multi_reduction <maximumf>, %22, %cst_17 [1] : vector<1x4x8xf32> to vector<1x8xf32>
    %c0_18 = arith.constant 0 : index
    %c3 = arith.constant 3 : index
    %c0_19 = arith.constant 0 : index
    %24 = vector.load %arg3[%c0_18, %c3, %c0_19] : memref<1x21x8xf32, #tpu.memory_space<vmem>>, vector<1x1x8xf32>
    %25 = vector.shape_cast %24 : vector<1x1x8xf32> to vector<1x8xf32>
    %26 = vector.shape_cast %23 : vector<1x8xf32> to vector<1x1x8xf32>
    tpu.vector_store %arg3[%c0_18, %c3, %c0_19], %26 {strides = array<i32>} : memref<1x21x8xf32, #tpu.memory_space<vmem>>, vector<1x1x8xf32>,
    %c0_20 = arith.constant 0 : index
    %c64 = arith.constant 64 : index
    %c0_21 = arith.constant 0 : index
    %27 = vector.load %arg2[%c0_20, %c64, %c0_21] : memref<1x256x8xf32, #tpu.memory_space<vmem>>, vector<1x16x8xf32>
    %c0_22 = arith.constant 0 : index
    %c80 = arith.constant 80 : index
    %c0_23 = arith.constant 0 : index
    %28 = vector.load %arg2[%c0_22, %c80, %c0_23] : memref<1x256x8xf32, #tpu.memory_space<vmem>>, vector<1x16x8xf32>
    %c0_24 = arith.constant 0 : index
    %c96 = arith.constant 96 : index
    %c0_25 = arith.constant 0 : index
    %29 = vector.load %arg2[%c0_24, %c96, %c0_25] : memref<1x256x8xf32, #tpu.memory_space<vmem>>, vector<1x16x8xf32>
    %c0_26 = arith.constant 0 : index
    %c112 = arith.constant 112 : index
    %c0_27 = arith.constant 0 : index
    %30 = vector.load %arg2[%c0_26, %c112, %c0_27] : memref<1x256x8xf32, #tpu.memory_space<vmem>>, vector<1x16x8xf32>
    %31 = arith.maximumf %27, %28 : vector<1x16x8xf32>
    %32 = arith.maximumf %29, %30 : vector<1x16x8xf32>
    %33 = arith.maximumf %31, %32 : vector<1x16x8xf32>
    %34 = vector.extract_strided_slice %33 {offsets = [0, 0, 0], sizes = [1, 4, 8], strides = [1, 1, 1]} : vector<1x16x8xf32> to vector<1x4x8xf32>
    %cst_28 = arith.constant dense<0xFF800000> : vector<1x8xf32>
    %35 = vector.multi_reduction <maximumf>, %34, %cst_28 [1] : vector<1x4x8xf32> to vector<1x8xf32>
    %c0_29 = arith.constant 0 : index
    %c4 = arith.constant 4 : index
    %c0_30 = arith.constant 0 : index
    %36 = vector.load %arg3[%c0_29, %c4, %c0_30] : memref<1x21x8xf32, #tpu.memory_space<vmem>>, vector<1x1x8xf32>
    %37 = vector.shape_cast %36 : vector<1x1x8xf32> to vector<1x8xf32>
    %38 = vector.shape_cast %35 : vector<1x8xf32> to vector<1x1x8xf32>
    tpu.vector_store %arg3[%c0_29, %c4, %c0_30], %38 {strides = array<i32>} : memref<1x21x8xf32, #tpu.memory_space<vmem>>, vector<1x1x8xf32>,
    %39 = vector.extract_strided_slice %33 {offsets = [0, 4, 0], sizes = [1, 4, 8], strides = [1, 1, 1]} : vector<1x16x8xf32> to vector<1x4x8xf32>
    %cst_31 = arith.constant dense<0xFF800000> : vector<1x8xf32>
    %40 = vector.multi_reduction <maximumf>, %39, %cst_31 [1] : vector<1x4x8xf32> to vector<1x8xf32>
    %c0_32 = arith.constant 0 : index
    %c5 = arith.constant 5 : index
    %c0_33 = arith.constant 0 : index
    %41 = vector.load %arg3[%c0_32, %c5, %c0_33] : memref<1x21x8xf32, #tpu.memory_space<vmem>>, vector<1x1x8xf32>
    %42 = vector.shape_cast %41 : vector<1x1x8xf32> to vector<1x8xf32>
    %43 = vector.shape_cast %40 : vector<1x8xf32> to vector<1x1x8xf32>
    tpu.vector_store %arg3[%c0_32, %c5, %c0_33], %43 {strides = array<i32>} : memref<1x21x8xf32, #tpu.memory_space<vmem>>, vector<1x1x8xf32>,
    %44 = vector.extract_strided_slice %33 {offsets = [0, 8, 0], sizes = [1, 4, 8], strides = [1, 1, 1]} : vector<1x16x8xf32> to vector<1x4x8xf32>
    %cst_34 = arith.constant dense<0xFF800000> : vector<1x8xf32>
    %45 = vector.multi_reduction <maximumf>, %44, %cst_34 [1] : vector<1x4x8xf32> to vector<1x8xf32>
    %c0_35 = arith.constant 0 : index
    %c6 = arith.constant 6 : index
    %c0_36 = arith.constant 0 : index
    %46 = vector.load %arg3[%c0_35, %c6, %c0_36] : memref<1x21x8xf32, #tpu.memory_space<vmem>>, vector<1x1x8xf32>
    %47 = vector.shape_cast %46 : vector<1x1x8xf32> to vector<1x8xf32>
    %48 = vector.shape_cast %45 : vector<1x8xf32> to vector<1x1x8xf32>
    tpu.vector_store %arg3[%c0_35, %c6, %c0_36], %48 {strides = array<i32>} : memref<1x21x8xf32, #tpu.memory_space<vmem>>, vector<1x1x8xf32>,
    %49 = vector.extract_strided_slice %33 {offsets = [0, 12, 0], sizes = [1, 4, 8], strides = [1, 1, 1]} : vector<1x16x8xf32> to vector<1x4x8xf32>
    %cst_37 = arith.constant dense<0xFF800000> : vector<1x8xf32>
    %50 = vector.multi_reduction <maximumf>, %49, %cst_37 [1] : vector<1x4x8xf32> to vector<1x8xf32>
    %c0_38 = arith.constant 0 : index
    %c7 = arith.constant 7 : index
    %c0_39 = arith.constant 0 : index
    %51 = vector.load %arg3[%c0_38, %c7, %c0_39] : memref<1x21x8xf32, #tpu.memory_space<vmem>>, vector<1x1x8xf32>
    %52 = vector.shape_cast %51 : vector<1x1x8xf32> to vector<1x8xf32>
    %53 = vector.shape_cast %50 : vector<1x8xf32> to vector<1x1x8xf32>
    tpu.vector_store %arg3[%c0_38, %c7, %c0_39], %53 {strides = array<i32>} : memref<1x21x8xf32, #tpu.memory_space<vmem>>, vector<1x1x8xf32>,
    %c0_40 = arith.constant 0 : index
    %c128 = arith.constant 128 : index
    %c0_41 = arith.constant 0 : index
    %54 = vector.load %arg2[%c0_40, %c128, %c0_41] : memref<1x256x8xf32, #tpu.memory_space<vmem>>, vector<1x16x8xf32>
    %c0_42 = arith.constant 0 : index
    %c144 = arith.constant 144 : index
    %c0_43 = arith.constant 0 : index
    %55 = vector.load %arg2[%c0_42, %c144, %c0_43] : memref<1x256x8xf32, #tpu.memory_space<vmem>>, vector<1x16x8xf32>
    %c0_44 = arith.constant 0 : index
    %c160 = arith.constant 160 : index
    %c0_45 = arith.constant 0 : index
    %56 = vector.load %arg2[%c0_44, %c160, %c0_45] : memref<1x256x8xf32, #tpu.memory_space<vmem>>, vector<1x16x8xf32>
    %c0_46 = arith.constant 0 : index
    %c176 = arith.constant 176 : index
    %c0_47 = arith.constant 0 : index
    %57 = vector.load %arg2[%c0_46, %c176, %c0_47] : memref<1x256x8xf32, #tpu.memory_space<vmem>>, vector<1x16x8xf32>
    %58 = arith.maximumf %54, %55 : vector<1x16x8xf32>
    %59 = arith.maximumf %56, %57 : vector<1x16x8xf32>
    %60 = arith.maximumf %58, %59 : vector<1x16x8xf32>
    %61 = vector.extract_strided_slice %60 {offsets = [0, 0, 0], sizes = [1, 4, 8], strides = [1, 1, 1]} : vector<1x16x8xf32> to vector<1x4x8xf32>
    %cst_48 = arith.constant dense<0xFF800000> : vector<1x8xf32>
    %62 = vector.multi_reduction <maximumf>, %61, %cst_48 [1] : vector<1x4x8xf32> to vector<1x8xf32>
    %c0_49 = arith.constant 0 : index
    %c8 = arith.constant 8 : index
    %c0_50 = arith.constant 0 : index
    %63 = vector.load %arg3[%c0_49, %c8, %c0_50] : memref<1x21x8xf32, #tpu.memory_space<vmem>>, vector<1x1x8xf32>
    %64 = vector.shape_cast %63 : vector<1x1x8xf32> to vector<1x8xf32>
    %65 = vector.shape_cast %62 : vector<1x8xf32> to vector<1x1x8xf32>
    tpu.vector_store %arg3[%c0_49, %c8, %c0_50], %65 {strides = array<i32>} : memref<1x21x8xf32, #tpu.memory_space<vmem>>, vector<1x1x8xf32>,
    %66 = vector.extract_strided_slice %60 {offsets = [0, 4, 0], sizes = [1, 4, 8], strides = [1, 1, 1]} : vector<1x16x8xf32> to vector<1x4x8xf32>
    %cst_51 = arith.constant dense<0xFF800000> : vector<1x8xf32>
    %67 = vector.multi_reduction <maximumf>, %66, %cst_51 [1] : vector<1x4x8xf32> to vector<1x8xf32>
    %c0_52 = arith.constant 0 : index
    %c9 = arith.constant 9 : index
    %c0_53 = arith.constant 0 : index
    %68 = vector.load %arg3[%c0_52, %c9, %c0_53] : memref<1x21x8xf32, #tpu.memory_space<vmem>>, vector<1x1x8xf32>
    %69 = vector.shape_cast %68 : vector<1x1x8xf32> to vector<1x8xf32>
    %70 = vector.shape_cast %67 : vector<1x8xf32> to vector<1x1x8xf32>
    tpu.vector_store %arg3[%c0_52, %c9, %c0_53], %70 {strides = array<i32>} : memref<1x21x8xf32, #tpu.memory_space<vmem>>, vector<1x1x8xf32>,
    %71 = vector.extract_strided_slice %60 {offsets = [0, 8, 0], sizes = [1, 4, 8], strides = [1, 1, 1]} : vector<1x16x8xf32> to vector<1x4x8xf32>
    %cst_54 = arith.constant dense<0xFF800000> : vector<1x8xf32>
    %72 = vector.multi_reduction <maximumf>, %71, %cst_54 [1] : vector<1x4x8xf32> to vector<1x8xf32>
    %c0_55 = arith.constant 0 : index
    %c10 = arith.constant 10 : index
    %c0_56 = arith.constant 0 : index
    %73 = vector.load %arg3[%c0_55, %c10, %c0_56] : memref<1x21x8xf32, #tpu.memory_space<vmem>>, vector<1x1x8xf32>
    %74 = vector.shape_cast %73 : vector<1x1x8xf32> to vector<1x8xf32>
    %75 = vector.shape_cast %72 : vector<1x8xf32> to vector<1x1x8xf32>
    tpu.vector_store %arg3[%c0_55, %c10, %c0_56], %75 {strides = array<i32>} : memref<1x21x8xf32, #tpu.memory_space<vmem>>, vector<1x1x8xf32>,
    %76 = vector.extract_strided_slice %60 {offsets = [0, 12, 0], sizes = [1, 4, 8], strides = [1, 1, 1]} : vector<1x16x8xf32> to vector<1x4x8xf32>
    %cst_57 = arith.constant dense<0xFF800000> : vector<1x8xf32>
    %77 = vector.multi_reduction <maximumf>, %76, %cst_57 [1] : vector<1x4x8xf32> to vector<1x8xf32>
    %c0_58 = arith.constant 0 : index
    %c11 = arith.constant 11 : index
    %c0_59 = arith.constant 0 : index
    %78 = vector.load %arg3[%c0_58, %c11, %c0_59] : memref<1x21x8xf32, #tpu.memory_space<vmem>>, vector<1x1x8xf32>
    %79 = vector.shape_cast %78 : vector<1x1x8xf32> to vector<1x8xf32>
    %80 = vector.shape_cast %77 : vector<1x8xf32> to vector<1x1x8xf32>
    tpu.vector_store %arg3[%c0_58, %c11, %c0_59], %80 {strides = array<i32>} : memref<1x21x8xf32, #tpu.memory_space<vmem>>, vector<1x1x8xf32>,
    %c0_60 = arith.constant 0 : index
    %c192 = arith.constant 192 : index
    %c0_61 = arith.constant 0 : index
    %81 = vector.load %arg2[%c0_60, %c192, %c0_61] : memref<1x256x8xf32, #tpu.memory_space<vmem>>, vector<1x16x8xf32>
    %c0_62 = arith.constant 0 : index
    %c208 = arith.constant 208 : index
    %c0_63 = arith.constant 0 : index
    %82 = vector.load %arg2[%c0_62, %c208, %c0_63] : memref<1x256x8xf32, #tpu.memory_space<vmem>>, vector<1x16x8xf32>
    %c0_64 = arith.constant 0 : index
    %c224 = arith.constant 224 : index
    %c0_65 = arith.constant 0 : index
    %83 = vector.load %arg2[%c0_64, %c224, %c0_65] : memref<1x256x8xf32, #tpu.memory_space<vmem>>, vector<1x16x8xf32>
    %c0_66 = arith.constant 0 : index
    %c240 = arith.constant 240 : index
    %c0_67 = arith.constant 0 : index
    %84 = vector.load %arg2[%c0_66, %c240, %c0_67] : memref<1x256x8xf32, #tpu.memory_space<vmem>>, vector<1x16x8xf32>
    %85 = arith.maximumf %81, %82 : vector<1x16x8xf32>
    %86 = arith.maximumf %83, %84 : vector<1x16x8xf32>
    %87 = arith.maximumf %85, %86 : vector<1x16x8xf32>
    %88 = vector.extract_strided_slice %87 {offsets = [0, 0, 0], sizes = [1, 4, 8], strides = [1, 1, 1]} : vector<1x16x8xf32> to vector<1x4x8xf32>
    %cst_68 = arith.constant dense<0xFF800000> : vector<1x8xf32>
    %89 = vector.multi_reduction <maximumf>, %88, %cst_68 [1] : vector<1x4x8xf32> to vector<1x8xf32>
    %c0_69 = arith.constant 0 : index
    %c12 = arith.constant 12 : index
    %c0_70 = arith.constant 0 : index
    %90 = vector.load %arg3[%c0_69, %c12, %c0_70] : memref<1x21x8xf32, #tpu.memory_space<vmem>>, vector<1x1x8xf32>
    %91 = vector.shape_cast %90 : vector<1x1x8xf32> to vector<1x8xf32>
    %92 = vector.shape_cast %89 : vector<1x8xf32> to vector<1x1x8xf32>
    tpu.vector_store %arg3[%c0_69, %c12, %c0_70], %92 {strides = array<i32>} : memref<1x21x8xf32, #tpu.memory_space<vmem>>, vector<1x1x8xf32>,
    %93 = vector.extract_strided_slice %87 {offsets = [0, 4, 0], sizes = [1, 4, 8], strides = [1, 1, 1]} : vector<1x16x8xf32> to vector<1x4x8xf32>
    %cst_71 = arith.constant dense<0xFF800000> : vector<1x8xf32>
    %94 = vector.multi_reduction <maximumf>, %93, %cst_71 [1] : vector<1x4x8xf32> to vector<1x8xf32>
    %c0_72 = arith.constant 0 : index
    %c13 = arith.constant 13 : index
    %c0_73 = arith.constant 0 : index
    %95 = vector.load %arg3[%c0_72, %c13, %c0_73] : memref<1x21x8xf32, #tpu.memory_space<vmem>>, vector<1x1x8xf32>
    %96 = vector.shape_cast %95 : vector<1x1x8xf32> to vector<1x8xf32>
    %97 = vector.shape_cast %94 : vector<1x8xf32> to vector<1x1x8xf32>
    tpu.vector_store %arg3[%c0_72, %c13, %c0_73], %97 {strides = array<i32>} : memref<1x21x8xf32, #tpu.memory_space<vmem>>, vector<1x1x8xf32>,
    %98 = vector.extract_strided_slice %87 {offsets = [0, 8, 0], sizes = [1, 4, 8], strides = [1, 1, 1]} : vector<1x16x8xf32> to vector<1x4x8xf32>
    %cst_74 = arith.constant dense<0xFF800000> : vector<1x8xf32>
    %99 = vector.multi_reduction <maximumf>, %98, %cst_74 [1] : vector<1x4x8xf32> to vector<1x8xf32>
    %c0_75 = arith.constant 0 : index
    %c14 = arith.constant 14 : index
    %c0_76 = arith.constant 0 : index
    %100 = vector.load %arg3[%c0_75, %c14, %c0_76] : memref<1x21x8xf32, #tpu.memory_space<vmem>>, vector<1x1x8xf32>
    %101 = vector.shape_cast %100 : vector<1x1x8xf32> to vector<1x8xf32>
    %102 = vector.shape_cast %99 : vector<1x8xf32> to vector<1x1x8xf32>
    tpu.vector_store %arg3[%c0_75, %c14, %c0_76], %102 {strides = array<i32>} : memref<1x21x8xf32, #tpu.memory_space<vmem>>, vector<1x1x8xf32>,
    %103 = vector.extract_strided_slice %87 {offsets = [0, 12, 0], sizes = [1, 4, 8], strides = [1, 1, 1]} : vector<1x16x8xf32> to vector<1x4x8xf32>
    %cst_77 = arith.constant dense<0xFF800000> : vector<1x8xf32>
    %104 = vector.multi_reduction <maximumf>, %103, %cst_77 [1] : vector<1x4x8xf32> to vector<1x8xf32>
    %c0_78 = arith.constant 0 : index
    %c15 = arith.constant 15 : index
    %c0_79 = arith.constant 0 : index
    %105 = vector.load %arg3[%c0_78, %c15, %c0_79] : memref<1x21x8xf32, #tpu.memory_space<vmem>>, vector<1x1x8xf32>
    %106 = vector.shape_cast %105 : vector<1x1x8xf32> to vector<1x8xf32>
    %107 = vector.shape_cast %104 : vector<1x8xf32> to vector<1x1x8xf32>
    tpu.vector_store %arg3[%c0_78, %c15, %c0_79], %107 {strides = array<i32>} : memref<1x21x8xf32, #tpu.memory_space<vmem>>, vector<1x1x8xf32>,
    %c0_80 = arith.constant 0 : index
    %c0_81 = arith.constant 0 : index
    %c0_82 = arith.constant 0 : index
    %108 = vector.load %arg3[%c0_80, %c0_81, %c0_82] : memref<1x21x8xf32, #tpu.memory_space<vmem>>, vector<1x1x8xf32>
    %109 = vector.shape_cast %108 : vector<1x1x8xf32> to vector<1x8xf32>
    %c0_83 = arith.constant 0 : index
    %c1_84 = arith.constant 1 : index
    %c0_85 = arith.constant 0 : index
    %110 = vector.load %arg3[%c0_83, %c1_84, %c0_85] : memref<1x21x8xf32, #tpu.memory_space<vmem>>, vector<1x1x8xf32>
    %111 = vector.shape_cast %110 : vector<1x1x8xf32> to vector<1x8xf32>
    %c0_86 = arith.constant 0 : index
    %c4_87 = arith.constant 4 : index
    %c0_88 = arith.constant 0 : index
    %112 = vector.load %arg3[%c0_86, %c4_87, %c0_88] : memref<1x21x8xf32, #tpu.memory_space<vmem>>, vector<1x1x8xf32>
    %113 = vector.shape_cast %112 : vector<1x1x8xf32> to vector<1x8xf32>
    %c0_89 = arith.constant 0 : index
    %c5_90 = arith.constant 5 : index
    %c0_91 = arith.constant 0 : index
    %114 = vector.load %arg3[%c0_89, %c5_90, %c0_91] : memref<1x21x8xf32, #tpu.memory_space<vmem>>, vector<1x1x8xf32>
    %115 = vector.shape_cast %114 : vector<1x1x8xf32> to vector<1x8xf32>
    %116 = arith.maximumf %109, %111 : vector<1x8xf32>
    %117 = arith.maximumf %113, %115 : vector<1x8xf32>
    %118 = arith.maximumf %116, %117 : vector<1x8xf32>
    %c0_92 = arith.constant 0 : index
    %c16_93 = arith.constant 16 : index
    %c0_94 = arith.constant 0 : index
    %119 = vector.load %arg3[%c0_92, %c16_93, %c0_94] : memref<1x21x8xf32, #tpu.memory_space<vmem>>, vector<1x1x8xf32>
    %120 = vector.shape_cast %119 : vector<1x1x8xf32> to vector<1x8xf32>
    %121 = vector.shape_cast %118 : vector<1x8xf32> to vector<1x1x8xf32>
    tpu.vector_store %arg3[%c0_92, %c16_93, %c0_94], %121 {strides = array<i32>} : memref<1x21x8xf32, #tpu.memory_space<vmem>>, vector<1x1x8xf32>,
    %c0_95 = arith.constant 0 : index
    %c2_96 = arith.constant 2 : index
    %c0_97 = arith.constant 0 : index
    %122 = vector.load %arg3[%c0_95, %c2_96, %c0_97] : memref<1x21x8xf32, #tpu.memory_space<vmem>>, vector<1x1x8xf32>
    %123 = vector.shape_cast %122 : vector<1x1x8xf32> to vector<1x8xf32>
    %c0_98 = arith.constant 0 : index
    %c3_99 = arith.constant 3 : index
    %c0_100 = arith.constant 0 : index
    %124 = vector.load %arg3[%c0_98, %c3_99, %c0_100] : memref<1x21x8xf32, #tpu.memory_space<vmem>>, vector<1x1x8xf32>
    %125 = vector.shape_cast %124 : vector<1x1x8xf32> to vector<1x8xf32>
    %c0_101 = arith.constant 0 : index
    %c6_102 = arith.constant 6 : index
    %c0_103 = arith.constant 0 : index
    %126 = vector.load %arg3[%c0_101, %c6_102, %c0_103] : memref<1x21x8xf32, #tpu.memory_space<vmem>>, vector<1x1x8xf32>
    %127 = vector.shape_cast %126 : vector<1x1x8xf32> to vector<1x8xf32>
    %c0_104 = arith.constant 0 : index
    %c7_105 = arith.constant 7 : index
    %c0_106 = arith.constant 0 : index
    %128 = vector.load %arg3[%c0_104, %c7_105, %c0_106] : memref<1x21x8xf32, #tpu.memory_space<vmem>>, vector<1x1x8xf32>
    %129 = vector.shape_cast %128 : vector<1x1x8xf32> to vector<1x8xf32>
    %130 = arith.maximumf %123, %125 : vector<1x8xf32>
    %131 = arith.maximumf %127, %129 : vector<1x8xf32>
    %132 = arith.maximumf %130, %131 : vector<1x8xf32>
    %c0_107 = arith.constant 0 : index
    %c17 = arith.constant 17 : index
    %c0_108 = arith.constant 0 : index
    %133 = vector.load %arg3[%c0_107, %c17, %c0_108] : memref<1x21x8xf32, #tpu.memory_space<vmem>>, vector<1x1x8xf32>
    %134 = vector.shape_cast %133 : vector<1x1x8xf32> to vector<1x8xf32>
    %135 = vector.shape_cast %132 : vector<1x8xf32> to vector<1x1x8xf32>
    tpu.vector_store %arg3[%c0_107, %c17, %c0_108], %135 {strides = array<i32>} : memref<1x21x8xf32, #tpu.memory_space<vmem>>, vector<1x1x8xf32>,
    %c0_109 = arith.constant 0 : index
    %c8_110 = arith.constant 8 : index
    %c0_111 = arith.constant 0 : index
    %136 = vector.load %arg3[%c0_109, %c8_110, %c0_111] : memref<1x21x8xf32, #tpu.memory_space<vmem>>, vector<1x1x8xf32>
    %137 = vector.shape_cast %136 : vector<1x1x8xf32> to vector<1x8xf32>
    %c0_112 = arith.constant 0 : index
    %c9_113 = arith.constant 9 : index
    %c0_114 = arith.constant 0 : index
    %138 = vector.load %arg3[%c0_112, %c9_113, %c0_114] : memref<1x21x8xf32, #tpu.memory_space<vmem>>, vector<1x1x8xf32>
    %139 = vector.shape_cast %138 : vector<1x1x8xf32> to vector<1x8xf32>
    %c0_115 = arith.constant 0 : index
    %c12_116 = arith.constant 12 : index
    %c0_117 = arith.constant 0 : index
    %140 = vector.load %arg3[%c0_115, %c12_116, %c0_117] : memref<1x21x8xf32, #tpu.memory_space<vmem>>, vector<1x1x8xf32>
    %141 = vector.shape_cast %140 : vector<1x1x8xf32> to vector<1x8xf32>
    %c0_118 = arith.constant 0 : index
    %c13_119 = arith.constant 13 : index
    %c0_120 = arith.constant 0 : index
    %142 = vector.load %arg3[%c0_118, %c13_119, %c0_120] : memref<1x21x8xf32, #tpu.memory_space<vmem>>, vector<1x1x8xf32>
    %143 = vector.shape_cast %142 : vector<1x1x8xf32> to vector<1x8xf32>
    %144 = arith.maximumf %137, %139 : vector<1x8xf32>
    %145 = arith.maximumf %141, %143 : vector<1x8xf32>
    %146 = arith.maximumf %144, %145 : vector<1x8xf32>
    %c0_121 = arith.constant 0 : index
    %c18 = arith.constant 18 : index
    %c0_122 = arith.constant 0 : index
    %147 = vector.load %arg3[%c0_121, %c18, %c0_122] : memref<1x21x8xf32, #tpu.memory_space<vmem>>, vector<1x1x8xf32>
    %148 = vector.shape_cast %147 : vector<1x1x8xf32> to vector<1x8xf32>
    %149 = vector.shape_cast %146 : vector<1x8xf32> to vector<1x1x8xf32>
    tpu.vector_store %arg3[%c0_121, %c18, %c0_122], %149 {strides = array<i32>} : memref<1x21x8xf32, #tpu.memory_space<vmem>>, vector<1x1x8xf32>,
    %c0_123 = arith.constant 0 : index
    %c10_124 = arith.constant 10 : index
    %c0_125 = arith.constant 0 : index
    %150 = vector.load %arg3[%c0_123, %c10_124, %c0_125] : memref<1x21x8xf32, #tpu.memory_space<vmem>>, vector<1x1x8xf32>
    %151 = vector.shape_cast %150 : vector<1x1x8xf32> to vector<1x8xf32>
    %c0_126 = arith.constant 0 : index
    %c11_127 = arith.constant 11 : index
    %c0_128 = arith.constant 0 : index
    %152 = vector.load %arg3[%c0_126, %c11_127, %c0_128] : memref<1x21x8xf32, #tpu.memory_space<vmem>>, vector<1x1x8xf32>
    %153 = vector.shape_cast %152 : vector<1x1x8xf32> to vector<1x8xf32>
    %c0_129 = arith.constant 0 : index
    %c14_130 = arith.constant 14 : index
    %c0_131 = arith.constant 0 : index
    %154 = vector.load %arg3[%c0_129, %c14_130, %c0_131] : memref<1x21x8xf32, #tpu.memory_space<vmem>>, vector<1x1x8xf32>
    %155 = vector.shape_cast %154 : vector<1x1x8xf32> to vector<1x8xf32>
    %c0_132 = arith.constant 0 : index
    %c15_133 = arith.constant 15 : index
    %c0_134 = arith.constant 0 : index
    %156 = vector.load %arg3[%c0_132, %c15_133, %c0_134] : memref<1x21x8xf32, #tpu.memory_space<vmem>>, vector<1x1x8xf32>
    %157 = vector.shape_cast %156 : vector<1x1x8xf32> to vector<1x8xf32>
    %158 = arith.maximumf %151, %153 : vector<1x8xf32>
    %159 = arith.maximumf %155, %157 : vector<1x8xf32>
    %160 = arith.maximumf %158, %159 : vector<1x8xf32>
    %c0_135 = arith.constant 0 : index
    %c19 = arith.constant 19 : index
    %c0_136 = arith.constant 0 : index
    %161 = vector.load %arg3[%c0_135, %c19, %c0_136] : memref<1x21x8xf32, #tpu.memory_space<vmem>>, vector<1x1x8xf32>
    %162 = vector.shape_cast %161 : vector<1x1x8xf32> to vector<1x8xf32>
    %163 = vector.shape_cast %160 : vector<1x8xf32> to vector<1x1x8xf32>
    tpu.vector_store %arg3[%c0_135, %c19, %c0_136], %163 {strides = array<i32>} : memref<1x21x8xf32, #tpu.memory_space<vmem>>, vector<1x1x8xf32>,
    %c0_137 = arith.constant 0 : index
    %c0_138 = arith.constant 0 : index
    %c0_139 = arith.constant 0 : index
    %164 = vector.load %arg3[%c0_137, %c0_138, %c0_139] : memref<1x21x8xf32, #tpu.memory_space<vmem>>, vector<1x16x8xf32>
    %cst_140 = arith.constant dense<0xFF800000> : vector<1x8xf32>
    %165 = vector.multi_reduction <maximumf>, %164, %cst_140 [1] : vector<1x16x8xf32> to vector<1x8xf32>
    %c0_141 = arith.constant 0 : index
    %c20 = arith.constant 20 : index
    %c0_142 = arith.constant 0 : index
    %166 = vector.load %arg3[%c0_141, %c20, %c0_142] : memref<1x21x8xf32, #tpu.memory_space<vmem>>, vector<1x1x8xf32>
    %167 = vector.shape_cast %166 : vector<1x1x8xf32> to vector<1x8xf32>
    %168 = vector.shape_cast %165 : vector<1x8xf32> to vector<1x1x8xf32>
    tpu.vector_store %arg3[%c0_141, %c20, %c0_142], %168 {strides = array<i32>} : memref<1x21x8xf32, #tpu.memory_space<vmem>>, vector<1x1x8xf32>,
    return
  }
  func.func @transform_0(%arg0: i32, %arg1: i32) -> (i32, i32, i32) {
    %c0_i32 = arith.constant 0 : i32
    %c0_i32_0 = arith.constant 0 : i32
    return %arg0, %c0_i32, %arg1 : i32, i32, i32
  }
  func.func @transform_1(%arg0: i32, %arg1: i32) -> (i32, i32, i32) {
    %c0_i32 = arith.constant 0 : i32
    %c0_i32_0 = arith.constant 0 : i32
    return %arg0, %c0_i32, %arg1 : i32, i32, i32
  }
}

</mosaic_0001>

<bundles_post_ra>
// kernel: tpu_custom_call.1
= control target key start
LH: loop header
LB: loop body
LE: loop exit
PB: predicated region body
PF: predicated region fallthrough
CT: control target
= control target key end

     0   :  { %vm22_vm0 = vcmask 60416   ;;  %vm32_vm1 = vcmask 64516   ;;  %vm30_vm2 = vcmask 57344   ;;  %vm229_vm3 = vcmask 64512   ;;  %s510_s0 = inlined_call_operand.vmem [shape: f32[1,256,8], index: 0, kind: input, shape index: {}]   ;;  %s511_s1 = inlined_call_operand.vmem [shape: f32[1,21,8], index: 1, kind: output, shape index: {}]  }
   0x1   :  { %v8_v0 = vld [vmem:[%s510_s0] sm:$0xff]  ;;  %v10_v1 = vld [vmem:[%s510_s0 + $0x10] sm:$0xff]  ;;  %v9_v5 = vld [vmem:[%s510_s0 + $0x8] sm:$0xff] }
   0x2   :  { %v12_v2 = vld [vmem:[%s510_s0 + $0x20] sm:$0xff]  ;;  %v14_v3 = vld [vmem:[%s510_s0 + $0x30] sm:$0xff]  ;;  %v16_v4 = vmax.f32 %v8_v0, %v10_v1  ;;  %v11_v6 = vld [vmem:[%s510_s0 + $0x18] sm:$0xff] }
   0x3   :  { %v18_v7 = vmax.f32 %v12_v2, %v14_v3  ;;  %v13_v8 = vld [vmem:[%s510_s0 + $0x28] sm:$0xff]  ;;  %v15_v9 = vld [vmem:[%s510_s0 + $0x38] sm:$0xff]  ;;  %v17_v10 = vmax.f32 %v9_v5, %v11_v6  ;;  %v57_v11 = vld [vmem:[%s510_s0 + $0x40] sm:$0xff] }
   0x4   :  { %v19_v12 = vmax.f32 %v13_v8, %v15_v9  ;;  %v59_v13 = vld [vmem:[%s510_s0 + $0x50] sm:$0xff]  ;;  %v61_v14 = vld [vmem:[%s510_s0 + $0x60] sm:$0xff]  ;;  %v58_v19 = vld [vmem:[%s510_s0 + $0x48] sm:$0xff] }
   0x5   :  { %v63_v15 = vld [vmem:[%s510_s0 + $0x70] sm:$0xff]  ;;  %v20_v16 = vmax.f32 %v16_v4, %v18_v7  ;;  %v65_v17 = vmax.f32 %v57_v11, %v59_v13  ;;  %v60_v20 = vld [vmem:[%s510_s0 + $0x58] sm:$0xff]  ;;  %v62_v21 = vld [vmem:[%s510_s0 + $0x68] sm:$0xff] }
   0x6   :  { %v67_v18 = vmax.f32 %v61_v14, %v63_v15  ;;  %v21_v22 = vmax.f32 %v17_v10, %v19_v12  ;;  %v64_v23 = vld [vmem:[%s510_s0 + $0x78] sm:$0xff]  ;;  %v66_v24 = vmax.f32 %v58_v19, %v60_v20  ;;  %v309_v33 = vld [vmem:[%s510_s0 + $0x80] sm:$0xff]  ;;  %v314_v34 = vld [vmem:[%s510_s0 + $0x90] sm:$0xff] }
   0x7   :  { %v23_v25 = vsel %vm22_vm0, %v20_v16, -inf  ;;  %v33_v26 = vsel %vm32_vm1, %v20_v16, -inf  ;;  %v68_v28 = vmax.f32 %v62_v21, %v64_v23  ;;  %v111_v46 = vmax.f32 %v309_v33, %v314_v34  ;;  %v107_v63 = vld [vmem:[%s510_s0 + $0xa0] sm:$0xff]  ;;  %v109_v0 = vld [vmem:[%s510_s0 + $0xb0] sm:$0xff]  ;;  %v104_v5 = vld [vmem:[%s510_s0 + $0x88] sm:$0xff] }
   0x8   :  { %v69_v27 = vmax.f32 %v65_v17, %v67_v18  ;;  %v24_v29 = vrot.slane %v23_v25, 4  ;;  %v34_v30 = vrot.slane %v33_v26, 4  ;;  %v41_v31 = vsel %vm22_vm0, %v21_v22, -inf  ;;  %v106_v6 = vld [vmem:[%s510_s0 + $0x98] sm:$0xff]  ;;  %v108_v7 = vld [vmem:[%s510_s0 + $0xa8] sm:$0xff]  ;;  %v149_v13 = vld [vmem:[%s510_s0 + $0xc0] sm:$0xff] }
   0x9   :  { %v49_v32 = vsel %vm32_vm1, %v21_v22, -inf  ;;  %v42_v35 = vrot.slane %v41_v31, 4  ;;  %v70_v45 = vmax.f32 %v66_v24, %v68_v28  ;;  %v110_v12 = vld [vmem:[%s510_s0 + $0xb8] sm:$0xff]  ;;  %v151_v14 = vld [vmem:[%s510_s0 + $0xd0] sm:$0xff]  ;;  %v153_v19 = vld [vmem:[%s510_s0 + $0xe0] sm:$0xff] }
   0xa   :  { %v50_v36 = vrot.slane %v49_v32, 4  ;;  %v71_v37 = vsel %vm22_vm0, %v69_v27, -inf  ;;  %v79_v38 = vsel %vm32_vm1, %v69_v27, -inf  ;;  %v25_v39 = vmax.f32 %v23_v25, %v24_v29  ;;  %v155_v20 = vld [vmem:[%s510_s0 + $0xf0] sm:$0xff]  ;;  %v150_v21 = vld [vmem:[%s510_s0 + $0xc8] sm:$0xff]  ;;  %v156_v28 = vld [vmem:[%s510_s0 + $0xf8] sm:$0xff] }
   0xb   :  { %v35_v40 = vmax.f32 %v33_v26, %v34_v30  ;;  %v72_v41 = vrot.slane %v71_v37, 4  ;;  %v80_v42 = vrot.slane %v79_v38, 4  ;;  %v43_v43 = vmax.f32 %v41_v31, %v42_v35  ;;  %v152_v26 = vld [vmem:[%s510_s0 + $0xd8] sm:$0xff]  ;;  %v154_v27 = vld [vmem:[%s510_s0 + $0xe8] sm:$0xff] }
   0xc   :  { %v51_v44 = vmax.f32 %v49_v32, %v50_v36  ;;  %v26_v47 = vrot.slane %v25_v39, 2  ;;  %v87_v53 = vsel %vm22_vm0, %v70_v45, -inf  ;;  %v95_v54 = vsel %vm32_vm1, %v70_v45, -inf }
   0xd   :  { %v36_v48 = vrot.slane %v35_v40, 2  ;;  %v73_v49 = vmax.f32 %v71_v37, %v72_v41  ;;  %v81_v50 = vmax.f32 %v79_v38, %v80_v42  ;;  %v44_v51 = vrot.slane %v43_v43, 2 }
   0xe   :  { %v52_v52 = vrot.slane %v51_v44, 2  ;;  %v27_v55 = vmax.f32 %v25_v39, %v26_v47  ;;  %v88_v61 = vrot.slane %v87_v53, 4  ;;  %v96_v62 = vrot.slane %v95_v54, 4 }
   0xf   :  { %v37_v56 = vmax.f32 %v35_v40, %v36_v48  ;;  %v74_v57 = vrot.slane %v73_v49, 2  ;;  %v82_v58 = vrot.slane %v81_v50, 2  ;;  %v45_v59 = vmax.f32 %v43_v43, %v44_v51 }
  0x10   :  { %v53_v60 = vmax.f32 %v51_v44, %v52_v52  ;;  %v28_v1 = vrot.slane %v27_v55, 1  ;;  %v89_v10 = vmax.f32 %v87_v53, %v88_v61  ;;  %v97_v11 = vmax.f32 %v95_v54, %v96_v62 }
  0x11   :  { %v38_v2 = vrot.slane %v37_v56, 1  ;;  %v75_v3 = vmax.f32 %v73_v49, %v74_v57  ;;  %v83_v4 = vmax.f32 %v81_v50, %v82_v58  ;;  %v46_v8 = vrot.slane %v45_v59, 1 }
  0x12   :  { %v54_v9 = vrot.slane %v53_v60, 1  ;;  %v29_v15 = vmax.f32 %v27_v55, %v28_v1  ;;  %v90_v24 = vrot.slane %v89_v10, 2  ;;  %v98_v25 = vrot.slane %v97_v11, 2 }
  0x13   :  { %v39_v16 = vmax.f32 %v37_v56, %v38_v2  ;;  %v76_v17 = vrot.slane %v75_v3, 1  ;;  %v84_v18 = vrot.slane %v83_v4, 1  ;;  %v47_v22 = vmax.f32 %v45_v59, %v46_v8 }
  0x14   :  { %v55_v23 = vmax.f32 %v53_v60, %v54_v9  ;;  %31 = vst.msk [vmem:[%s511_s1] sm:$0x1] %vm30_vm2, %v29_v15  ;;  %v113_v31 = vmax.f32 %v107_v63, %v109_v0  ;;  %v112_v32 = vmax.f32 %v104_v5, %v106_v6  ;;  %v91_v33 = vmax.f32 %v89_v10, %v90_v24 }
  0x15   :  { %40 = vst.msk [vmem:[%s511_s1 + $0x1] sm:$0x1] %vm30_vm2, %v39_v16  ;;  %v77_v29 = vmax.f32 %v75_v3, %v76_v17  ;;  %v85_v30 = vmax.f32 %v83_v4, %v84_v18  ;;  %48 = vst.msk [vmem:[%s511_s1 + $0x2] sm:$0x1] %vm30_vm2, %v47_v22  ;;  %v99_v34 = vmax.f32 %v97_v11, %v98_v25 }
  0x16   :  { %56 = vst.msk [vmem:[%s511_s1 + $0x3] sm:$0x1] %vm30_vm2, %v55_v23  ;;  %v114_v35 = vmax.f32 %v108_v7, %v110_v12  ;;  %v157_v36 = vmax.f32 %v149_v13, %v151_v14  ;;  %v115_v37 = vmax.f32 %v111_v46, %v113_v31  ;;  %v159_v38 = vmax.f32 %v153_v19, %v155_v20 }
  0x17   :  { %78 = vst.msk [vmem:[%s511_s1 + $0x4] sm:$0x1] %vm30_vm2, %v77_v29  ;;  %86 = vst.msk [vmem:[%s511_s1 + $0x5] sm:$0x1] %vm30_vm2, %v85_v30  ;;  %v158_v39 = vmax.f32 %v150_v21, %v152_v26  ;;  %v160_v40 = vmax.f32 %v154_v27, %v156_v28  ;;  %v92_v41 = vrot.slane %v91_v33, 1  ;;  %v100_v42 = vrot.slane %v99_v34, 1 }
  0x18   :  { %v116_v43 = vmax.f32 %v112_v32, %v114_v35  ;;  %v117_v44 = vsel %vm22_vm0, %v115_v37, -inf  ;;  %v125_v45 = vsel %vm32_vm1, %v115_v37, -inf  ;;  %v161_v47 = vmax.f32 %v157_v36, %v159_v38 }
  0x19   :  { %v162_v48 = vmax.f32 %v158_v39, %v160_v40  ;;  %v93_v49 = vmax.f32 %v91_v33, %v92_v41  ;;  %v101_v50 = vmax.f32 %v99_v34, %v100_v42  ;;  %v118_v51 = vrot.slane %v117_v44, 4 }
  0x1a   :  { %v126_v52 = vrot.slane %v125_v45, 4  ;;  %v133_v53 = vsel %vm22_vm0, %v116_v43, -inf  ;;  %v141_v46 = vsel %vm32_vm1, %v116_v43, -inf  ;;  %v163_v54 = vsel %vm22_vm0, %v161_v47, -inf }
  0x1b   :  { %v171_v55 = vsel %vm32_vm1, %v161_v47, -inf  ;;  %94 = vst.msk [vmem:[%s511_s1 + $0x6] sm:$0x1] %vm30_vm2, %v93_v49  ;;  %102 = vst.msk [vmem:[%s511_s1 + $0x7] sm:$0x1] %vm30_vm2, %v101_v50  ;;  %v119_v56 = vmax.f32 %v117_v44, %v118_v51  ;;  %v134_v58 = vrot.slane %v133_v53, 4 }
  0x1c   :  { %v127_v57 = vmax.f32 %v125_v45, %v126_v52  ;;  %v142_v59 = vrot.slane %v141_v46, 4  ;;  %v164_v60 = vrot.slane %v163_v54, 4  ;;  %v172_v61 = vrot.slane %v171_v55, 4  ;;  %v195_v20 = vld [vmem:[%s511_s1] sm:$0x1] }
  0x1d   :  { %v179_v62 = vsel %vm22_vm0, %v162_v48, -inf  ;;  %v187_v63 = vsel %vm32_vm1, %v162_v48, -inf  ;;  %v120_v0 = vrot.slane %v119_v56, 2  ;;  %v135_v2 = vmax.f32 %v133_v53, %v134_v58  ;;  %v196_v21 = vld [vmem:[%s511_s1 + $0x1] sm:$0x1] }
  0x1e   :  { %v128_v1 = vrot.slane %v127_v57, 2  ;;  %v143_v3 = vmax.f32 %v141_v46, %v142_v59  ;;  %v165_v4 = vmax.f32 %v163_v54, %v164_v60  ;;  %v173_v5 = vmax.f32 %v171_v55, %v172_v61  ;;  %v197_v26 = vld [vmem:[%s511_s1 + $0x4] sm:$0x1]  ;;  %v198_v27 = vld [vmem:[%s511_s1 + $0x5] sm:$0x1] }
  0x1f   :  { %v180_v6 = vrot.slane %v179_v62, 4  ;;  %v188_v7 = vrot.slane %v187_v63, 4  ;;  %v121_v8 = vmax.f32 %v119_v56, %v120_v0  ;;  %v136_v10 = vrot.slane %v135_v2, 2  ;;  %v203_v32 = vld [vmem:[%s511_s1 + $0x2] sm:$0x1] }
  0x20   :  { %v129_v9 = vmax.f32 %v127_v57, %v128_v1  ;;  %v144_v11 = vrot.slane %v143_v3, 2  ;;  %v166_v12 = vrot.slane %v165_v4, 2  ;;  %v174_v13 = vrot.slane %v173_v5, 2  ;;  %v204_v33 = vld [vmem:[%s511_s1 + $0x3] sm:$0x1] }
  0x21   :  { %v181_v14 = vmax.f32 %v179_v62, %v180_v6  ;;  %v189_v15 = vmax.f32 %v187_v63, %v188_v7  ;;  %v122_v16 = vrot.slane %v121_v8, 1  ;;  %v137_v18 = vmax.f32 %v135_v2, %v136_v10 }
  0x22   :  { %v130_v17 = vrot.slane %v129_v9, 1  ;;  %v145_v19 = vmax.f32 %v143_v3, %v144_v11  ;;  %v167_v22 = vmax.f32 %v165_v4, %v166_v12  ;;  %v175_v23 = vmax.f32 %v173_v5, %v174_v13  ;;  %v205_v38 = vld [vmem:[%s511_s1 + $0x6] sm:$0x1]  ;;  %v206_v39 = vld [vmem:[%s511_s1 + $0x7] sm:$0x1] }
  0x23   :  { %v182_v24 = vrot.slane %v181_v14, 2  ;;  %v190_v25 = vrot.slane %v189_v15, 2  ;;  %v123_v28 = vmax.f32 %v121_v8, %v122_v16  ;;  %v138_v30 = vrot.slane %v137_v18, 1  ;;  %v227_v56 = vld [vmem:[%s511_s1] sm:$0xff] }
  0x24   :  { %v131_v29 = vmax.f32 %v129_v9, %v130_v17  ;;  %v146_v31 = vrot.slane %v145_v19, 1  ;;  %v168_v34 = vrot.slane %v167_v22, 1  ;;  %v176_v35 = vrot.slane %v175_v23, 1 }
  0x25   :  { %v183_v36 = vmax.f32 %v181_v14, %v182_v24  ;;  %v191_v37 = vmax.f32 %v189_v15, %v190_v25  ;;  %124 = vst.msk [vmem:[%s511_s1 + $0x8] sm:$0x1] %vm30_vm2, %v123_v28  ;;  %v139_v40 = vmax.f32 %v137_v18, %v138_v30  ;;  %v199_v42 = vmax.f32 %v195_v20, %v196_v21 }
  0x26   :  { %132 = vst.msk [vmem:[%s511_s1 + $0x9] sm:$0x1] %vm30_vm2, %v131_v29  ;;  %v147_v41 = vmax.f32 %v145_v19, %v146_v31  ;;  %v200_v43 = vmax.f32 %v197_v26, %v198_v27  ;;  %v169_v44 = vmax.f32 %v167_v22, %v168_v34  ;;  %v177_v45 = vmax.f32 %v175_v23, %v176_v35 }
  0x27   :  { %v184_v47 = vrot.slane %v183_v36, 1  ;;  %v192_v48 = vrot.slane %v191_v37, 1  ;;  %140 = vst.msk [vmem:[%s511_s1 + $0xa] sm:$0x1] %vm30_vm2, %v139_v40  ;;  %v207_v50 = vmax.f32 %v203_v32, %v204_v33  ;;  %v208_v51 = vmax.f32 %v205_v38, %v206_v39 }
  0x28   :  { %148 = vst.msk [vmem:[%s511_s1 + $0xb] sm:$0x1] %vm30_vm2, %v147_v41  ;;  %v201_v49 = vmax.f32 %v199_v42, %v200_v43  ;;  %170 = vst.msk [vmem:[%s511_s1 + $0xc] sm:$0x1] %vm30_vm2, %v169_v44  ;;  %v230_v0 = vsel %vm229_vm3, %v227_v56, -inf }
  0x29   :  { %178 = vst.msk [vmem:[%s511_s1 + $0xd] sm:$0x1] %vm30_vm2, %v177_v45  ;;  %v185_v52 = vmax.f32 %v183_v36, %v184_v47  ;;  %v193_v53 = vmax.f32 %v191_v37, %v192_v48  ;;  %v209_v46 = vmax.f32 %v207_v50, %v208_v51 }
  0x2a   :  { %202 = vst.msk [vmem:[%s511_s1 + $0x10] sm:$0x1] %vm30_vm2, %v201_v49 }
  0x2b   :  { %186 = vst.msk [vmem:[%s511_s1 + $0xe] sm:$0x1] %vm30_vm2, %v185_v52  ;;  %194 = vst.msk [vmem:[%s511_s1 + $0xf] sm:$0x1] %vm30_vm2, %v193_v53 }
  0x2c   :  { %210 = vst.msk [vmem:[%s511_s1 + $0x11] sm:$0x1] %vm30_vm2, %v209_v46  ;;  %v211_v54 = vld [vmem:[%s511_s1 + $0x8] sm:$0x1] }
  0x2d   :  { %v212_v55 = vld [vmem:[%s511_s1 + $0x9] sm:$0x1] }
  0x2e   :  { %v215_v57 = vmax.f32 %v211_v54, %v212_v55  ;;  %v219_v58 = vld [vmem:[%s511_s1 + $0xa] sm:$0x1] }
  0x2f   :  { %v220_v59 = vld [vmem:[%s511_s1 + $0xb] sm:$0x1]  ;;  %v213_v60 = vld [vmem:[%s511_s1 + $0xc] sm:$0x1] }
  0x30   :  { %v214_v61 = vld [vmem:[%s511_s1 + $0xd] sm:$0x1]  ;;  %v223_v63 = vmax.f32 %v219_v58, %v220_v59 }
  0x31   :  { %v216_v62 = vmax.f32 %v213_v60, %v214_v61 }
  0x32   :  { %v221_v1 = vld [vmem:[%s511_s1 + $0xe] sm:$0x1]  ;;  %v222_v2 = vld [vmem:[%s511_s1 + $0xf] sm:$0x1] }
  0x33   :  { %v228_v3 = vld [vmem:[%s511_s1 + $0x8] sm:$0xff]  ;;  %v217_v4 = vmax.f32 %v215_v57, %v216_v62  ;;  %v224_v5 = vmax.f32 %v221_v1, %v222_v2 }
  0x34   :  { %v231_v6 = vsel %vm229_vm3, %v228_v3, -inf }
  0x35   :  { %v232_v7 = vmax.f32 %v230_v0, %v231_v6  ;;  %218 = vst.msk [vmem:[%s511_s1 + $0x12] sm:$0x1] %vm30_vm2, %v217_v4  ;;  %v225_v8 = vmax.f32 %v223_v63, %v224_v5 }
  0x37   :  { %v233_v9 = vrot.slane %v232_v7, 4  ;;  %226 = vst.msk [vmem:[%s511_s1 + $0x13] sm:$0x1] %vm30_vm2, %v225_v8 }
  0x39   :  { %v234_v10 = vmax.f32 %v232_v7, %v233_v9 }
  0x3b   :  { %v235_v11 = vrot.slane %v234_v10, 2 }
  0x3d   :  { %v236_v12 = vmax.f32 %v234_v10, %v235_v11 }
  0x3f   :  { %v237_v13 = vrot.slane %v236_v12, 1 }
  0x41   :  { %v238_v14 = vmax.f32 %v236_v12, %v237_v13 }
  0x43   :  { %239 = vst.msk [vmem:[%s511_s1 + $0x14] sm:$0x1] %vm30_vm2, %v238_v14 }

</bundles_post_ra>
